<compile_context>
chip_gen: v7x
topology: tpu7x:2x2x1
jax: 0.10.0
libtpu: 0.0.40
codegen_flags: <defaults>
</compile_context>

<pallas_src>
import math

import jax
import jax.numpy as jnp
from jax.experimental import pallas as pl
from jax.experimental.pallas import tpu as pltpu

_MIB = 1024 * 1024


def _round_up(x, m):
    return ((x + m - 1) // m) * m


def _largest_divisor_tile(total, cap):
    """Largest multiple of 128 that divides `total` and is <= cap (>= 128)."""
    cap = max(128, min(cap, total))
    cap = (cap // 128) * 128
    for t in range(cap, 127, -128):
        if total % t == 0:
            return t
    return 128


def _pad_cast(x, shape, dtype):
    """Cast to dtype and zero-pad up to `shape` (no pad copy if already sized)."""
    x = x.astype(dtype)
    if tuple(x.shape) == tuple(shape):
        return x
    pad = [(0, s - d) for s, d in zip(shape, x.shape)]
    return jnp.pad(x, pad)


def _vmem_capacity_bytes():
    try:
        return int(pltpu.get_tpu_info().vmem_capacity_bytes)
    except Exception:
        return 64 * _MIB  # conservative default (v7x per-TensorCore VMEM)


# ---------------------------------------------------------------------------
# Stage 1: support = feature @ weight   (row tiles, weight resident)
# ---------------------------------------------------------------------------
def _support_kernel(feat_ref, w_ref, s_ref):
    s_ref[...] = jnp.dot(
        feat_ref[...], w_ref[...], preferred_element_type=jnp.float32
    ).astype(s_ref.dtype)


# ---------------------------------------------------------------------------
# Stage 2: out = ReLU(adj @ support + bias)   (row tiles x K-reduction tiles)
# ---------------------------------------------------------------------------
def _make_aggregate_kernel(tk, resident_support, use_scratch):
    def kernel(adj_ref, sup_ref, b_ref, o_ref, *scratch):
        k = pl.program_id(1)
        # When the output dtype is f32, the resident output block doubles as
        # the accumulator (saves a VMEM scratch and an epilogue copy).
        acc_ref = scratch[0] if use_scratch else o_ref

        @pl.when(k == 0)
        def _():
            acc_ref[...] = jnp.zeros_like(acc_ref)

        if resident_support:
            start = pl.multiple_of(k * tk, 128)
            sup = sup_ref[pl.ds(start, tk), :]     # slice the VMEM-resident slab
        else:
            sup = sup_ref[...]

        acc_ref[...] += jnp.dot(
            adj_ref[...], sup, preferred_element_type=jnp.float32
        ).astype(acc_ref.dtype)

        # Epilogue only on the last reduction step: bias + ReLU + downcast.
        @pl.when(k == pl.num_programs(1) - 1)
        def _():
            out = acc_ref[...].astype(jnp.float32) + b_ref[...].astype(jnp.float32)
            o_ref[...] = jnp.maximum(out, 0.0).astype(o_ref.dtype)

    return kernel


def graph_conv_layer(feature, adj, weight, bias, *, compute_dtype=jnp.bfloat16,
                     max_tk=None, resident_support=None):
    """ReLU(adj @ (feature @ weight) + bias) via two tiled Pallas TPU kernels.

    compute_dtype: dtype the MXU operands are streamed in (accumulation is
      always f32).  bf16 (default) halves HBM traffic of the bandwidth-bound
      adjacency stream; pass jnp.float32 for bit-tighter numerics.
    max_tk / resident_support: optional overrides of the auto tile selection
      (mainly for testing the multi-step-K and streamed-support paths).
    """
    N, f_in = feature.shape
    f_out = weight.shape[1]
    out_dtype = feature.dtype
    if compute_dtype is None:
        compute_dtype = out_dtype
    c_item = jnp.dtype(compute_dtype).itemsize
    out_item = jnp.dtype(out_dtype).itemsize

    vmem_cap = _vmem_capacity_bytes()
    budget = int(vmem_cap * 0.55)          # leave pipeline / compiler headroom

    # ---- pad only up to 128 multiples (lane-dense output, MXU-aligned) ----
    n_pad = _round_up(N, 128)
    f_in_p = _round_up(f_in, 128)
    f_out_p = _round_up(f_out, 128)

    feat_p = _pad_cast(feature, (n_pad, f_in_p), compute_dtype)
    adj_p = _pad_cast(adj, (n_pad, n_pad), compute_dtype)
    w_p = _pad_cast(weight, (f_in_p, f_out_p), compute_dtype)
    b_p = _pad_cast(bias.reshape(1, f_out), (1, f_out_p), jnp.float32)

    # ---- tile selection ----------------------------------------------------
    # Row tile: up to 512, dividing n_pad; keep >=2 row tiles when possible so
    # the "parallel" axis can actually split across v7x's two TensorCores.
    tm = _largest_divisor_tile(n_pad, 512)
    if n_pad // tm < 2 and n_pad >= 256:
        tm = _largest_divisor_tile(n_pad, n_pad // 2)

    # Keep the whole `support` matrix VMEM-resident in stage 2 when small.
    support_bytes = n_pad * f_out_p * c_item
    if resident_support is None:
        resident_support = 2 * support_bytes <= min(budget // 3, 16 * _MIB)

    use_scratch = out_dtype != jnp.float32   # f32 outputs accumulate in place

    fixed = 2 * tm * f_out_p * out_item + 2 * 8 * f_out_p * 4     # out + bias
    if use_scratch:
        fixed += tm * f_out_p * 4
    if resident_support:
        fixed += 2 * support_bytes
    per_tk_row = 2 * tm * c_item + (0 if resident_support else 2 * f_out_p * c_item)
    tk_cap = max(128, (budget - fixed) // per_tk_row)
    tk_limit = 8192 if max_tk is None else max_tk
    tk = _largest_divisor_tile(n_pad, min(tk_cap, tk_limit))

    # ---- stage 1: support = feature @ W ------------------------------------
    # TODO(synk): add a K-tiled reduction over F_in if f_in_p * f_out_p ever
    # outgrows VMEM (weight kept fully resident for typical GCN widths).
    w_bytes = 2 * f_in_p * f_out_p * c_item
    row1_bytes = 2 * f_in_p * c_item + 2 * f_out_p * c_item
    tm1 = _largest_divisor_tile(
        n_pad, min(tm, max(128, (budget - w_bytes) // row1_bytes)))
    est1 = w_bytes + tm1 * row1_bytes
    vmem1 = int(min(max(2 * est1, 32 * _MIB), int(vmem_cap * 0.9)))

    support = pl.pallas_call(
        _support_kernel,
        out_shape=jax.ShapeDtypeStruct((n_pad, f_out_p), compute_dtype),
        grid_spec=pltpu.PrefetchScalarGridSpec(
            num_scalar_prefetch=0,
            grid=(n_pad // tm1,),
            in_specs=[
                pl.BlockSpec((tm1, f_in_p), lambda i: (i, 0)),
                pl.BlockSpec((f_in_p, f_out_p), lambda i: (0, 0)),
            ],
            out_specs=pl.BlockSpec((tm1, f_out_p), lambda i: (i, 0)),
        ),
        compiler_params=pltpu.CompilerParams(
            dimension_semantics=("parallel",),
            vmem_limit_bytes=vmem1,
        ),
        cost_estimate=pl.CostEstimate(
            flops=2 * n_pad * f_in_p * f_out_p,
            transcendentals=0,
            bytes_accessed=c_item * (n_pad * f_in_p + f_in_p * f_out_p
                                     + n_pad * f_out_p),
        ),
    )(feat_p, w_p)

    # ---- stage 2: ReLU(adj @ support + bias) --------------------------------
    if resident_support:
        sup_spec = pl.BlockSpec((n_pad, f_out_p), lambda i, k: (0, 0))
        sup_read_bytes = n_pad * f_out_p * c_item
    else:
        sup_spec = pl.BlockSpec((tk, f_out_p), lambda i, k: (k, 0))
        sup_read_bytes = (n_pad // tm) * n_pad * f_out_p * c_item

    scratch_shapes = [pltpu.VMEM((tm, f_out_p), jnp.float32)] if use_scratch else []

    est2 = fixed + per_tk_row * tk
    vmem2 = int(min(max(int(1.5 * est2) + 4 * _MIB, 32 * _MIB),
                    int(vmem_cap * 0.9)))

    out_p = pl.pallas_call(
        _make_aggregate_kernel(tk, resident_support, use_scratch),
        out_shape=jax.ShapeDtypeStruct((n_pad, f_out_p), out_dtype),
        grid_spec=pltpu.PrefetchScalarGridSpec(
            num_scalar_prefetch=0,
            grid=(n_pad // tm, n_pad // tk),
            in_specs=[
                pl.BlockSpec((tm, tk), lambda i, k: (i, k)),        # adj tile
                sup_spec,                                           # support
                pl.BlockSpec((1, f_out_p), lambda i, k: (0, 0)),    # bias
            ],
            out_specs=pl.BlockSpec((tm, f_out_p), lambda i, k: (i, 0)),
            scratch_shapes=scratch_shapes,
        ),
        compiler_params=pltpu.CompilerParams(
            dimension_semantics=("parallel", "arbitrary"),
            vmem_limit_bytes=vmem2,
        ),
        cost_estimate=pl.CostEstimate(
            flops=2 * n_pad * n_pad * f_out_p,
            transcendentals=0,
            bytes_accessed=(c_item * n_pad * n_pad            # adj stream
                            + sup_read_bytes                  # support (re)reads
                            + out_item * n_pad * f_out_p      # output
                            + 4 * f_out_p),                   # bias
        ),
    )(adj_p, support, b_p)

    # slice padding away
    return out_p[:N, :f_out]


def init_params(key, in_features, out_features):
    """Deterministic parameter init mirroring the PyTorch __init__."""
    kw, kb = jax.random.split(key)
    # xavier_uniform_: U(-a, a), a = sqrt(6 / (fan_in + fan_out))
    a = math.sqrt(6.0 / (in_features + out_features))
    weight = jax.random.uniform(kw, (in_features, out_features),
                                minval=-a, maxval=a, dtype=jnp.float32)
    # bias: U(-stdv, stdv), stdv = 1/sqrt(out_features)
    stdv = 1.0 / math.sqrt(out_features)
    bias = jax.random.uniform(kb, (out_features,),
                              minval=-stdv, maxval=stdv, dtype=jnp.float32)
    return weight, bias


def _reference(feature, adj, weight, bias):
    support = jnp.dot(feature, weight, precision=jax.lax.Precision.HIGHEST)
    output = jnp.dot(adj, support, precision=jax.lax.Precision.HIGHEST)
    return jnp.maximum(output + bias, 0.0)


if __name__ == "__main__":
    key = jax.random.PRNGKey(0)
    k_feat, k_adj, k_param = jax.random.split(key, 3)

    # Small graph with ragged (non-128) dims so the padding path is exercised.
    N, in_features, out_features = 200, 96, 70

    feature = jax.random.normal(k_feat, (N, in_features), dtype=jnp.float32)
    a = jax.random.uniform(k_adj, (N, N), dtype=jnp.float32)
    adj = (a + a.T) * 0.5
    adj = adj / adj.sum(axis=1, keepdims=True)        # row-normalized adjacency
    weight, bias = init_params(k_param, in_features, out_features)

    ref = _reference(feature, adj, weight, bias)

    # 1) f32 MXU operands, auto tiles (resident support, in-place f32 acc).
    out = jax.block_until_ready(
        graph_conv_layer(feature, adj, weight, bias, compute_dtype=jnp.float32))
    assert out.shape == (N, out_features)
    assert jnp.allclose(out, ref, atol=1e-3, rtol=1e-3), "f32 path mismatch"

    # 2) default bf16 MXU operands, forced multi-step K with VMEM-resident
    #    support (exercises the in-kernel dynamic slice + accumulation).
    out = jax.block_until_ready(
        graph_conv_layer(feature, adj, weight, bias, max_tk=128))
    assert out.shape == (N, out_features)
    assert jnp.allclose(out, ref, atol=2e-2, rtol=2e-2), "bf16 resident mismatch"

    # 3) bf16 MXU operands, forced multi-step K with streamed support tiles.
    out = jax.block_until_ready(
        graph_conv_layer(feature, adj, weight, bias,
                         max_tk=128, resident_support=False))
    assert out.shape == (N, out_features)
    assert jnp.allclose(out, ref, atol=2e-2, rtol=2e-2), "bf16 streamed mismatch"

    # 4) bf16 I/O (exercises the separate f32 scratch-accumulator epilogue).
    out = jax.block_until_ready(
        graph_conv_layer(feature.astype(jnp.bfloat16), adj.astype(jnp.bfloat16),
                         weight.astype(jnp.bfloat16), bias.astype(jnp.bfloat16)))
    assert out.shape == (N, out_features) and out.dtype == jnp.bfloat16
    assert jnp.allclose(out.astype(jnp.float32), ref,
                        atol=5e-2, rtol=5e-2), "bf16 io mismatch"

    print("KERNEL_OK")
</pallas_src>

<mosaic_0001>
module attributes {stable_mosaic.version = 11 : i64} {
  func.func @_support_kernel(%arg0: i32, %arg1: memref<128x128xf32, #tpu.memory_space<vmem>>, %arg2: memref<128x128xf32, #tpu.memory_space<vmem>>, %arg3: memref<128x128xf32, #tpu.memory_space<vmem>>) attributes {dimension_semantics = [#tpu.dimension_semantics<parallel>], iteration_bounds = array<i64: 2>, scalar_prefetch = 0 : i64, scratch_operands = 0 : i64, tpu.core_type = #tpu.core_type<tc>, window_params = [{transform_indices = @transform_0, window_bounds = array<i64: 128, 128>}, {pipeline_mode = #tpu.pipeline_mode<synchronous>, transform_indices = @transform_1, window_bounds = array<i64: 128, 128>}, {transform_indices = @transform_2, window_bounds = array<i64: 128, 128>}]} {
    %c0 = arith.constant 0 : index
    %c0_0 = arith.constant 0 : index
    %0 = vector.load %arg1[%c0, %c0_0] : memref<128x128xf32, #tpu.memory_space<vmem>>, vector<128x128xf32>
    %c0_1 = arith.constant 0 : index
    %c0_2 = arith.constant 0 : index
    %1 = vector.load %arg2[%c0_1, %c0_2] : memref<128x128xf32, #tpu.memory_space<vmem>>, vector<128x128xf32>
    %cst = arith.constant dense<0.000000e+00> : vector<128x128xf32>
    %2 = tpu.matmul %0, %1, %cst {dimension_numbers = #tpu.dot_dimension_numbers<[1], [0], [0], [1], [0, 0, 1, 1], [], []>} : vector<128x128xf32>, vector<128x128xf32>, vector<128x128xf32> -> vector<128x128xf32>
    %c0_3 = arith.constant 0 : index
    %c0_4 = arith.constant 0 : index
    %3 = vector.load %arg3[%c0_3, %c0_4] : memref<128x128xf32, #tpu.memory_space<vmem>>, vector<128x128xf32>
    tpu.vector_store %arg3[%c0_3, %c0_4], %2 {strides = array<i32>} : memref<128x128xf32, #tpu.memory_space<vmem>>, vector<128x128xf32>,
    return
  }
  func.func @transform_0(%arg0: i32) -> (i32, i32) {
    %c0_i32 = arith.constant 0 : i32
    %c0_i32_0 = arith.constant 0 : i32
    return %arg0, %c0_i32 : i32, i32
  }
  func.func @transform_1(%arg0: i32) -> (i32, i32) {
    %c0_i32 = arith.constant 0 : i32
    %c0_i32_0 = arith.constant 0 : i32
    %c0_i32_1 = arith.constant 0 : i32
    return %c0_i32, %c0_i32_0 : i32, i32
  }
  func.func @transform_2(%arg0: i32) -> (i32, i32) {
    %c0_i32 = arith.constant 0 : i32
    %c0_i32_0 = arith.constant 0 : i32
    return %arg0, %c0_i32 : i32, i32
  }
}

</mosaic_0001>

<bundles_post_ra>
// kernel: tpu_custom_call.1
= control target key start
LH: loop header
LB: loop body
LE: loop exit
PB: predicated region body
PF: predicated region fallthrough
CT: control target
= control target key end

     0   :  { %7 = vsyncpa [#allocation3], 0  ;;  %s1084_s0 = inlined_call_operand.hbm [shape: f32[256,128], index: 0, kind: input, shape index: {}]   ;;  %s1085_s1 = inlined_call_operand.hbm [shape: f32[128,128], index: 1, kind: input, shape index: {}]   ;;  %s1086_s2 = inlined_call_operand.hbm [shape: f32[256,128], index: 2, kind: output, shape index: {}]  }
   0x1   :  { %9 = vsyncpa [#allocation3 + $0x1], 0 }
   0x2   :  { %10 = vsyncpa [#allocation6], 0 }
   0x3   :  { %11 = vsyncpa [#allocation4], 0 }
   0x4   :  { %13 = vsyncpa [#allocation4 + $0x1], 0  ;;  %s836_s9 = smov 0   ;;  %s838_s10 = smov 0  }
   0x5   :  { %s840_s11 = smov 0   ;;  %s842_s12 = smov 0  }
   0x6 LB: > { %s857_s13 = sadd.s32 4294967295, %s812_s12   ;;  %s469_s14 = sadd.s32 4294967294, %s812_s12   ;;  %s812_s12 = sphi %s842_s12, %s1106_s12   ;;  %s808_s11 = sphi %s840_s11, %s1105_s11   ;;  %s804_s10 = sphi %s838_s10, %s1104_s10   ;;  %s800_s9 = sphi %s836_s9, %s1103_s9  }
   0x7   : > { %p39_p0 = scmp.ne.s32.totalorder %s804_s10, %s800_s9  ;;  %p1087_p1 = scmp.eq.s32.totalorder %s857_s13, 0 }
   0x8   : > { %p90_p3 = scmp.eq.s32.totalorder %s469_s14, 1  ;;  %p470_p5 = scmp.ge.s32.totalorder %s812_s12, 1 }
   0x9   : > { %p866_p4 = por %p1087_p1, %p39_p0  ;;  %p97_p7 = scmp.lt.s32.totalorder %s812_s12, 3 }
   0xa   : > { %p871_p6 = por %p90_p3, %p39_p0  ;;  %s814_s18 = smov [#allocation5]  }
   0xb   : > { %s1090_s15 = scalar_select %p866_p4, 1, 0 }
   0xc   : > { %s1091_s16 = scalar_select %p871_p6, 1, 0 }
   0xd   : > { %p876_p8 = pnand %p470_p5, %p97_p7  ;;  %s109_s19 = sshll.u32 %s814_s18, 4  ;;  %s880_s19 = int_to_ptr.vmem [resolvable:$true] %s109_s19 }
   0xe   : > { %s892_s21 = sadd.s32 1, %s812_s12   ;;  %s26_s22 = sadd.s32 1, %s808_s11 }
   0xf   : > { %s1092_s17 = scalar_select %p876_p8, 1, 0 }
  0x10   : > { %p631_p9 = pneg %p876_p8  ;;  %s23_s23 = ssub.s32 %s812_s12, %s892_s21 }
  0x11   : > { %s684_s26 = scalar_lea.hbm %s1085_s1, 2048 }
  0x12   : > { %p887_p11 = pnand %p631_p9, %p1087_p1  ;;  %p685_p12 = scmp.ne.s32.totalorder %s1085_s1, %s684_s26 }
  0x13   : > { %p691_p5 = scmp.lt.u32.totalorder %s684_s26, %s1085_s1 }
  0x14   : > { %p686_p13 = pneg %p887_p11 }
  0x16   : > { %p687_p0 = pnand %p686_p13, %p685_p12 }
  0x18   : > { %p688_p3 = pneg %p687_p0 }
  0x1a   : > { %p693_p7 = pnand %p691_p5, %p688_p3 }
  0x1c   : > { %696 = shalt.err (!%p693_p7)
}
  0x1d   : > { %s697_s3 = scalar_lea.vmem %s880_s19, 2048  ;;  %p705_p2 = scmp.lt.s32.totalorder %s880_s19, %s880_s19 }
  0x1e   : > { %p698_p9 = scmp.ne.s32.totalorder %s880_s19, %s697_s3  ;;  %p706_p6 = scmp.lt.s32.totalorder %s697_s3, %s697_s3 }
  0x20   : > { %p700_p10 = pnand %p698_p9, %p686_p13  ;;  %p707_p4 = por %p706_p6, %p705_p2 }
  0x22   : > { %p701_p1 = pneg %p700_p10 }
  0x24   : > { %p708_p8 = pnand %p707_p4, %p701_p1 }
  0x26   : > { %711 = shalt.err (!%p708_p8)
}
  0x27   : > { %s815_s4 = smov 128   ;;  %s816_s5 = smov 8  }
  0x28   : > { %634 = dma.hbm_to_vmem [thread:$0]  (!%p887_p11), %s1085_s1, 2048, %s880_s19, [#allocation6], %s815_s4, %s815_s4, %s816_s5  }
  0x29   : > { %p24_p1 = scmp.eq.s32.totalorder %s23_s23, 0  ;;  %p33_p2 = scmp.ne.s32.totalorder %s808_s11, %s804_s10 }
  0x2a   : > { %p34_p4 = scmp.eq.s32.totalorder %s812_s12, 0  ;;  %p644_p6 = scmp.lt.s32.totalorder %s812_s12, 2 }
  0x2b   : > { %s926_s8 = scalar_select %p24_p1, %s808_s11, %s26_s22  }
  0x2c   : > { %p35_p8 = por %p34_p4, %p33_p2  ;;  %p1094_p10 = scmp.eq.s32.totalorder %s857_s13, 1 }
  0x2d   : > { %s123_s18 = sand.u32 1, %s808_s11   ;;  %s485_s20 = sshll.u32 %s812_s12, 11 }
  0x2e   : > { %p930_p12 = por %p1094_p10, %p33_p2  ;;  %s473_s24 = sshll.u32 %s123_s18, 7 }
  0x2f   : > { %s939_s27 = scalar_lea.hbm %s1084_s0, %s485_s20  ;;  %s127_s19 = scalar_lea.vmem [#allocation2], %s473_s24 }
  0x30   : > { %s134_s22 = sshll.u32 %s127_s19, 4  ;;  %p941_p11 = pnand %p644_p6, %p35_p8  ;;  %s945_s22 = int_to_ptr.vmem [resolvable:$true] %s134_s22 }
  0x31   : > { %s947_s28 = scalar_lea.sflag [#allocation3], %s123_s18  ;;  %s712_s29 = scalar_lea.hbm %s939_s27, 2048 }
  0x32   : > { %p713_p13 = scmp.ne.s32.totalorder %s939_s27, %s712_s29  ;;  %p714_p0 = pneg %p941_p11 }
  0x33   : > { %s717_s6 = scalar_lea.hbm %s1084_s0, 4096  ;;  %p718_p7 = scmp.lt.u32.totalorder %s939_s27, %s1084_s0 }
  0x34   : > { %p715_p3 = pnand %p714_p0, %p713_p13  ;;  %p719_p9 = scmp.lt.u32.totalorder %s717_s6, %s712_s29 }
  0x35   : > { %p721_p2 = scmp.lt.u32.totalorder %s712_s29, %s939_s27 }
  0x36   : > { %p716_p5 = pneg %p715_p3  ;;  %p720_p1 = por %p719_p9, %p718_p7 }
  0x38   : > { %p722_p4 = por %p721_p2, %p720_p1 }
  0x3a   : > { %p723_p6 = pnand %p722_p4, %p716_p5 }
  0x3c   : > { %726 = shalt.err (!%p723_p6)
}
  0x3d   : > { %s727_s18 = scalar_lea.vmem %s945_s22, 2048  ;;  %s817_s24 = smov [#allocation2]  }
  0x3e   : > { %p728_p8 = scmp.ne.s32.totalorder %s945_s22, %s727_s18  ;;  %s732_s25 = sshll.u32 %s817_s24, 4  ;;  %s733_s25 = int_to_ptr.vmem [resolvable:$false] %s732_s25 }
  0x3f   : > { %s734_s26 = scalar_lea.vmem %s733_s25, 4096  ;;  %p735_p3 = scmp.lt.s32.totalorder %s945_s22, %s733_s25 }
  0x40   : > { %p730_p10 = pnand %p728_p8, %p714_p0  ;;  %p736_p7 = scmp.lt.s32.totalorder %s734_s26, %s727_s18 }
  0x42   : > { %p731_p13 = pneg %p730_p10  ;;  %p737_p9 = por %p736_p7, %p735_p3 }
  0x44   : > { %p738_p1 = pnand %p737_p9, %p731_p13 }
  0x46   : > { %741 = shalt.err (!%p738_p1)
}
  0x47   : > { %638 = dma.hbm_to_vmem [thread:$0]  (!%p941_p11), %s939_s27, 2048, %s945_s22, %s947_s28, %s815_s4, %s815_s4, %s816_s5  }
  0x48   : > { %p1097_p0 = scmp.ne.s32.totalorder %s1092_s17, 0 }
  0x49   : > { %s981_s19 = sand.u32 (!%p1097_p0), 1, %s804_s10   ;;  %p1098_p5 = scmp.ne.s32.totalorder (!%p1097_p0), %s1090_s15, 0 }
  0x4a   : > { %146 = sbr.rel (%p1097_p0) target bundleno = 360 (0x168), region = 28  ;;  %s477_s29 = sshll.u32 (!%p1097_p0), %s981_s19, 7 }
  0x4b   : > { %s149_s30 = scalar_lea.sflag (!%p1097_p0), [#allocation3], %s981_s19  ;;  %s987_s23 = scalar_lea.vmem (!%p1097_p0), [#allocation2], %s477_s29 }
  0x51   : > { %787 = dma.done.wait (%p1098_p5), %s149_s30, 2048  }
  0x52   : > { %789 = vsyncadd (%p1098_p5), %s149_s30, 4294965248  ;;  %p1099_p11 = scmp.eq.s32.totalorder %s857_s13, 0 }
  0x54   : > { %791 = dma.done.wait (%p1099_p11), [#allocation6], 2048   ;;  %p1100_p2 = pmov %p1099_p11 }
  0x55   : > { %v195_v0 = vld [vmem:[#allocation5] sm:$0xff]  ;;  %v196_v1 = vld [vmem:[#allocation5 + $0x8] sm:$0xff]  ;;  %v197_v2 = vld [vmem:[#allocation5 + $0x10] sm:$0xff]  ;;  %s1015_s15 = scalar_lea.vmem [#allocation7], %s477_s29  ;;  %s486_s17 = sshll.u32 %s857_s13, 11 }
  0x56   : > { %793 = vsyncadd (%p1100_p2), [#allocation6], 4294965248  ;;  %v575_v3 = vpack.c.bf16 %v196_v1, %v195_v0  ;;  %v198_v4 = vld [vmem:[#allocation5 + $0x18] sm:$0xff]  ;;  %v199_v6 = vld [vmem:[#allocation5 + $0x20] sm:$0xff]  ;;  %s386_s4 = sshll.u32 %s1015_s15, 4  ;;  %s1034_s22 = scalar_lea.hbm %s1086_s2, %s486_s17  ;;  %s1036_s4 = int_to_ptr.vmem [resolvable:$true] %s386_s4 }
  0x57   : > { %v579_v5 = vpack.c.bf16 %v198_v4, %v197_v2  ;;  %v200_v7 = vld [vmem:[#allocation5 + $0x28] sm:$0xff]  ;;  %v179_v9 = vld [vmem:[%s987_s23] sm:$0xff]  ;;  %v201_v11 = vld [vmem:[#allocation5 + $0x30] sm:$0xff]  ;;  %s373_s13 = scalar_lea.sflag [#allocation4], %s981_s19  ;;  %s742_s28 = scalar_lea.vmem %s1036_s4, 2048 }
  0x58   : > { %576 = vmatprep.subr.bf16.mxu0 %v575_v3  ;;  %607 = vmatprep.subr.bf16.mxu1 %v575_v3  ;;  %v583_v8 = vpack.c.bf16 %v200_v7, %v199_v6  ;;  %v187_v10 = vld [vmem:[%s987_s23 + $0x40] sm:$0xff]  ;;  %v202_v12 = vld [vmem:[#allocation5 + $0x38] sm:$0xff]  ;;  %v204_v15 = vld [vmem:[#allocation5 + $0x48] sm:$0xff]  ;;  %p743_p4 = scmp.ne.s32.totalorder %s1036_s4, %s742_s28  ;;  %s818_s3 = smov [#allocation7]  }
  0x59   : > { %578 = vmatpush3.bf16.msra.mxu0 %v575_v3  ;;  %615 = vmatpush3.bf16.msra.mxu1 %v575_v3  ;;  %v587_v13 = vpack.c.bf16 %v202_v12, %v201_v11  ;;  %v203_v14 = vld [vmem:[#allocation5 + $0x40] sm:$0xff]  ;;  %v205_v17 = vld [vmem:[#allocation5 + $0x50] sm:$0xff]  ;;  %v206_v18 = vld [vmem:[#allocation5 + $0x58] sm:$0xff]  ;;  %s746_s6 = sshll.u32 %s818_s3, 4  ;;  %s747_s6 = int_to_ptr.vmem [resolvable:$false] %s746_s6 }
  0x5a   : > { %580 = vmatprep.subr.bf16.mxu0 %v579_v5  ;;  %608 = vmatprep.subr.bf16.mxu1 %v579_v5  ;;  %v591_v16 = vpack.c.bf16 %v204_v15, %v203_v14  ;;  %v595_v19 = vpack.c.bf16 %v206_v18, %v205_v17  ;;  %v207_v20 = vld [vmem:[#allocation5 + $0x60] sm:$0xff]  ;;  %v208_v21 = vld [vmem:[#allocation5 + $0x68] sm:$0xff]  ;;  %v209_v23 = vld [vmem:[#allocation5 + $0x70] sm:$0xff]  ;;  %p744_p6 = pnand %p743_p4, %p930_p12  ;;  %s748_s7 = scalar_lea.vmem %s747_s6, 4096 }
  0x5b   : > { %551 = vmatprep.mubr.f32.mxu0 %v179_v9  ;;  %563 = vmatprep.mubr.f32.mxu1 %v187_v10  ;;  %v599_v22 = vpack.c.bf16 %v208_v21, %v207_v20  ;;  %v210_v24 = vld [vmem:[#allocation5 + $0x78] sm:$0xff]  ;;  %v180_v26 = vld [vmem:[%s987_s23 + $0x8] sm:$0xff]  ;;  %v181_v28 = vld [vmem:[%s987_s23 + $0x10] sm:$0xff]  ;;  %p749_p10 = scmp.lt.s32.totalorder %s1036_s4, %s747_s6  ;;  %p750_p13 = scmp.lt.s32.totalorder %s748_s7, %s742_s28 }
  0x5c   : > { %v603_v25 = vpack.c.bf16 %v210_v24, %v209_v23  ;;  %v188_v27 = vld [vmem:[%s987_s23 + $0x48] sm:$0xff]  ;;  %v189_v29 = vld [vmem:[%s987_s23 + $0x50] sm:$0xff]  ;;  %v182_v30 = vld [vmem:[%s987_s23 + $0x18] sm:$0xff]  ;;  %p745_p8 = pneg %p744_p6 }
  0x5d   : > { %582 = vmatpush3.bf16.msra.mxu0 %v579_v5  ;;  %616 = vmatpush3.bf16.msra.mxu1 %v579_v5  ;;  %v190_v31 = vld [vmem:[%s987_s23 + $0x58] sm:$0xff]  ;;  %v183_v32 = vld [vmem:[%s987_s23 + $0x20] sm:$0xff]  ;;  %v184_v34 = vld [vmem:[%s987_s23 + $0x28] sm:$0xff]  ;;  %p751_p3 = por %p750_p13, %p749_p10 }
  0x5e   : > { %584 = vmatprep.subr.bf16.mxu0 %v583_v8  ;;  %609 = vmatprep.subr.bf16.mxu1 %v583_v8  ;;  %v191_v33 = vld [vmem:[%s987_s23 + $0x60] sm:$0xff]  ;;  %v192_v35 = vld [vmem:[%s987_s23 + $0x68] sm:$0xff]  ;;  %v185_v36 = vld [vmem:[%s987_s23 + $0x30] sm:$0xff] }
  0x5f   : > { %v193_v37 = vld [vmem:[%s987_s23 + $0x70] sm:$0xff]  ;;  %v186_v38 = vld [vmem:[%s987_s23 + $0x38] sm:$0xff]  ;;  %p752_p7 = pnand %p751_p3, %p745_p8 }
  0x60   : > { %v194_v39 = vld [vmem:[%s987_s23 + $0x78] sm:$0xff] }
  0x61   : > { %586 = vmatpush3.bf16.msra.mxu0 %v583_v8  ;;  %617 = vmatpush3.bf16.msra.mxu1 %v583_v8 }
  0x62   : > { %588 = vmatprep.subr.bf16.mxu0 %v587_v13  ;;  %610 = vmatprep.subr.bf16.mxu1 %v587_v13 }
  0x65   : > { %590 = vmatpush3.bf16.msra.mxu0 %v587_v13  ;;  %618 = vmatpush3.bf16.msra.mxu1 %v587_v13 }
  0x66   : > { %592 = vmatprep.subr.bf16.mxu0 %v591_v16  ;;  %611 = vmatprep.subr.bf16.mxu1 %v591_v16 }
  0x69   : > { %594 = vmatpush3.bf16.msra.mxu0 %v591_v16  ;;  %619 = vmatpush3.bf16.msra.mxu1 %v591_v16 }
  0x6a   : > { %596 = vmatprep.subr.bf16.mxu0 %v595_v19  ;;  %612 = vmatprep.subr.bf16.mxu1 %v595_v19 }
  0x6d   : > { %598 = vmatpush3.bf16.msra.mxu0 %v595_v19  ;;  %620 = vmatpush3.bf16.msra.mxu1 %v595_v19 }
  0x6e   : > { %600 = vmatprep.subr.bf16.mxu0 %v599_v22  ;;  %613 = vmatprep.subr.bf16.mxu1 %v599_v22 }
  0x71   : > { %602 = vmatpush3.bf16.msra.mxu0 %v599_v22  ;;  %621 = vmatpush3.bf16.msra.mxu1 %v599_v22 }
  0x72   : > { %604 = vmatprep.subr.bf16.mxu0 %v603_v25  ;;  %614 = vmatprep.subr.bf16.mxu1 %v603_v25 }
  0x75   : > { %606 = vmatpush3.bf16.msra.mxu0 %v603_v25  ;;  %622 = vmatpush3.bf16.msra.mxu1 %v603_v25 }
  0x78   : > { %552 = vmatmul.mubr.f32.vlgmr.msra.gmra.mrb[0].mxu0 %v180_v26  ;;  %564 = vmatmul.mubr.f32.vlgmr.msra.gmra.mrb[0].mxu1 %v188_v27 }
  0x79   : > { %554 = vmatprep.mubr.f32.mxu0 %v181_v28  ;;  %566 = vmatprep.mubr.f32.mxu1 %v189_v29 }
  0x7c   : > { %555 = vmatmul.mubr.f32.gmra.mrb[2].mxu0 %v182_v30  ;;  %567 = vmatmul.mubr.f32.gmra.mrb[2].mxu1 %v190_v31 }
  0x7d   : > { %557 = vmatprep.mubr.f32.mxu0 %v183_v32  ;;  %569 = vmatprep.mubr.f32.mxu1 %v191_v33 }
  0x80   : > { %558 = vmatmul.mubr.f32.gmra.mrb[4].mxu0 %v184_v34  ;;  %570 = vmatmul.mubr.f32.gmra.mrb[4].mxu1 %v192_v35 }
  0x81   : > { %560 = vmatprep.mubr.f32.mxu0 %v185_v36  ;;  %572 = vmatprep.mubr.f32.mxu1 %v193_v37 }
  0x84   : > { %561 = vmatmul.mubr.f32.gmra.mrb[6].mxu0 %v186_v38  ;;  %573 = vmatmul.mubr.f32.gmra.mrb[6].mxu1 %v194_v39 }
 0x14b   : > { %v553_v40 = vpop.f32.mrb[0].mxu0  ;;  %v565_v41 = vpop.f32.mrb[0].mxu1 }
 0x14c   : > { %357 = vst [vmem:[%s1015_s15 + $0x8] sm:$0xff] %v553_v40  ;;  %365 = vst [vmem:[%s1015_s15 + $0x48] sm:$0xff] %v565_v41  ;;  %v277_v42 = vpop.f32.mrb[1].mxu0  ;;  %v317_v43 = vpop.f32.mrb[1].mxu1 }
 0x14d   : > { %356 = vst [vmem:[%s1015_s15] sm:$0xff] %v277_v42  ;;  %364 = vst [vmem:[%s1015_s15 + $0x40] sm:$0xff] %v317_v43 }
 0x14f   : > { %v556_v44 = vpop.f32.mrb[2].mxu0  ;;  %v568_v45 = vpop.f32.mrb[2].mxu1 }
 0x150   : > { %359 = vst [vmem:[%s1015_s15 + $0x18] sm:$0xff] %v556_v44  ;;  %367 = vst [vmem:[%s1015_s15 + $0x58] sm:$0xff] %v568_v45  ;;  %v287_v46 = vpop.f32.mrb[3].mxu0  ;;  %v327_v47 = vpop.f32.mrb[3].mxu1 }
 0x151   : > { %358 = vst [vmem:[%s1015_s15 + $0x10] sm:$0xff] %v287_v46  ;;  %366 = vst [vmem:[%s1015_s15 + $0x50] sm:$0xff] %v327_v47 }
 0x153   : > { %v559_v48 = vpop.f32.mrb[4].mxu0  ;;  %v571_v49 = vpop.f32.mrb[4].mxu1 }
 0x154   : > { %361 = vst [vmem:[%s1015_s15 + $0x28] sm:$0xff] %v559_v48  ;;  %369 = vst [vmem:[%s1015_s15 + $0x68] sm:$0xff] %v571_v49  ;;  %v297_v50 = vpop.f32.mrb[5].mxu0  ;;  %v337_v51 = vpop.f32.mrb[5].mxu1 }
 0x155   : > { %360 = vst [vmem:[%s1015_s15 + $0x20] sm:$0xff] %v297_v50  ;;  %368 = vst [vmem:[%s1015_s15 + $0x60] sm:$0xff] %v337_v51 }
 0x157   : > { %v562_v52 = vpop.f32.mrb[6].mxu0  ;;  %v574_v53 = vpop.f32.mrb[6].mxu1 }
 0x158   : > { %363 = vst [vmem:[%s1015_s15 + $0x38] sm:$0xff] %v562_v52  ;;  %371 = vst [vmem:[%s1015_s15 + $0x78] sm:$0xff] %v574_v53  ;;  %v307_v54 = vpop.f32.mrb[7].mxu0  ;;  %v347_v55 = vpop.f32.mrb[7].mxu1 }
 0x159   : > { %362 = vst [vmem:[%s1015_s15 + $0x30] sm:$0xff] %v307_v54  ;;  %370 = vst [vmem:[%s1015_s15 + $0x70] sm:$0xff] %v347_v55 }
 0x15a   : > { %755 = shalt.err (!%p752_p7)
}
 0x15b   : > { %s756_s20 = scalar_lea.hbm %s1034_s22, 2048  ;;  %s760_s25 = scalar_lea.hbm %s1086_s2, 4096 }
 0x15c   : > { %p757_p9 = scmp.ne.s32.totalorder %s1034_s22, %s756_s20  ;;  %p761_p5 = scmp.lt.u32.totalorder %s1034_s22, %s1086_s2 }
 0x15d   : > { %p762_p11 = scmp.lt.u32.totalorder %s760_s25, %s756_s20  ;;  %p764_p4 = scmp.lt.u32.totalorder %s756_s20, %s1034_s22 }
 0x15e   : > { %p758_p1 = pnand %p757_p9, %p930_p12 }
 0x15f   : > { %p763_p2 = por %p762_p11, %p761_p5 }
 0x160   : > { %p759_p0 = pneg %p758_p1 }
 0x161   : > { %p765_p6 = por %p764_p4, %p763_p2 }
 0x163   : > { %p766_p8 = pnand %p765_p6, %p759_p0 }
 0x165   : > { %769 = shalt.err (!%p766_p8)
}
 0x166   : > { %s819_s30 = smov 128   ;;  %s820_s23 = smov 8  }
 0x167   : > { %629 = dma.vmem_to_hbm [thread:$0]  (%p930_p12), %s1036_s4, 2048, %s1034_s22, %s373_s13, %s819_s30, %s819_s30, %s820_s23  }
 0x168 PF: > { %s401_s15 = sand.u32 1, %s800_s9   ;;  %p1101_p10 = scmp.ne.s32.totalorder %s1091_s16, 0 }
 0x169   : > { %p1102_p13 = scmp.ge.s32.totalorder %s812_s12, 2  ;;  %s402_s17 = scalar_lea.sflag [#allocation4], %s401_s15 }
 0x16b   : > { %p640_p3 = pnand %p1102_p13, %p1101_p10 }
 0x16d   : > { %795 = dma.done.wait (!%p640_p3), %s402_s17, 2048  }
 0x16e   : > { %797 = vsyncadd (!%p640_p3), %s402_s17, 4294965248  ;;  %p16_p7 = scmp.ge.s32.totalorder %s892_s21, 4   ;;  %s1103_s9 = smov %s804_s10 }
 0x16f   : > { %s1104_s10 = smov %s808_s11  ;;  %s1105_s11 = smov %s926_s8 }
 0x170   : > { %s1106_s12 = smov %s892_s21  ;;  %18 = sbr.rel (!%p16_p7) target bundleno = 6 (0x6), region = 77 }
 0x177   :  { %407 = vsyncpa [#allocation3], 1 }
 0x178   :  { %409 = vsyncpa [#allocation3 + $0x1], 1 }
 0x179   :  { %410 = vsyncpa [#allocation6], 1 }
 0x17a   :  { %411 = vsyncpa [#allocation4], 1 }
 0x17b   :  { %413 = vsyncpa [#allocation4 + $0x1], 1 }

</bundles_post_ra>
